<compile_context>
chip_gen: v6e
topology: v6e:2x2x1
jax: 0.10.0
libtpu: 0.0.40
codegen_flags: <defaults>
</compile_context>

<pallas_src>
import math

import jax
import jax.numpy as jnp
from jax.experimental import pallas as pl
from jax.experimental.pallas import tpu as pltpu


def _round_up(v, m):
    return ((v + m - 1) // m) * m


def _make_kernel(N, tile_n, n_steps):
    """Kernel body closed over static batch size / tiling (for the row mask)."""

    def kernel(x_ref, y_ref, w1_ref, b1_ref, w2_ref, b2_ref, partial_ref, acc_ref):
        i = pl.program_id(0)

        @pl.when(i == 0)
        def _():
            acc_ref[...] = jnp.zeros_like(acc_ref)

        # Layer 1: h = tanh(x @ W1^T + b1), bf16 operands, f32 accumulation.
        # W1 stays in its original (H_p, D_in_p) layout; contract dim1 x dim1.
        h = jax.lax.dot_general(
            x_ref[...], w1_ref[...],
            dimension_numbers=(((1,), (1,)), ((), ())),
            preferred_element_type=jnp.float32,
        )
        h = jnp.tanh(h + b1_ref[...])                      # f32 VPU/EUP path

        # Layer 2: y_pred = h @ W2^T + b2 (W2 in (D_out_p, H_p) layout).
        y_pred = jax.lax.dot_general(
            h.astype(jnp.bfloat16), w2_ref[...],
            dimension_numbers=(((1,), (1,)), ((), ())),
            preferred_element_type=jnp.float32,
        )
        y_pred = y_pred + b2_ref[...]

        diff = y_pred - y_ref[...]                         # y kept in f32
        # Mask padded batch rows out of the sum-MSE (static N known at trace).
        row = i * tile_n + jax.lax.broadcasted_iota(jnp.int32, diff.shape, 0)
        d2 = jnp.where(row < N, diff * diff, 0.0)

        # Reduce only over the batch-tile axis per step; keep lanes intact.
        acc_ref[...] += jnp.sum(d2, axis=0, keepdims=True)

        @pl.when(i == n_steps - 1)
        def _():
            partial_ref[...] = acc_ref[...]

    return kernel


def twolayer_net_loss(x, y, w1, b1, w2, b2):
    """x:(N,D_in)  y:(N,D_out)  w1:(H,D_in) b1:(H,)  w2:(D_out,H) b2:(D_out,)

    Returns sum((linear2(tanh(linear1(x))) - y)**2) as a scalar (f32)."""
    N, D_in = x.shape
    D_out = y.shape[1]
    H = w1.shape[0]

    # Lane-dense padded feature dims (multiples of 128).
    D_in_p = _round_up(D_in, 128)
    H_p = _round_up(H, 128)
    D_out_p = _round_up(D_out, 128)

    # Batch tiling: biggest tile up to 512 rows (re-derived to comfortably fit
    # v7x's smaller VMEM with double-buffered x/y tiles + resident weights).
    tile_n = min(_round_up(N, 8), 512)
    n_steps = max(1, math.ceil(N / tile_n))
    N_pad = tile_n * n_steps

    f32 = jnp.float32
    bf16 = jnp.bfloat16

    def pad2(a, rows, cols):
        return jnp.pad(a, ((0, rows - a.shape[0]), (0, cols - a.shape[1])))

    # Matmul operands in bf16 (f32 accumulation in-kernel); biases / targets f32.
    x_p = pad2(jnp.asarray(x, f32).astype(bf16), N_pad, D_in_p)        # (N_pad, D_in_p)
    y_p = pad2(jnp.asarray(y, f32), N_pad, D_out_p)                    # (N_pad, D_out_p)
    w1_p = pad2(jnp.asarray(w1, f32).astype(bf16), H_p, D_in_p)        # (H_p, D_in_p)
    w2_p = pad2(jnp.asarray(w2, f32).astype(bf16), D_out_p, H_p)       # (D_out_p, H_p)
    b1_p = pad2(jnp.asarray(b1, f32).reshape(1, H), 1, H_p)            # (1, H_p)
    b2_p = pad2(jnp.asarray(b2, f32).reshape(1, D_out), 1, D_out_p)    # (1, D_out_p)

    kernel = _make_kernel(N, tile_n, n_steps)

    grid_spec = pltpu.PrefetchScalarGridSpec(
        num_scalar_prefetch=0,
        grid=(n_steps,),
        in_specs=[
            # Pipelined (double-buffered) per-tile operands.
            pl.BlockSpec((tile_n, D_in_p), lambda i: (i, 0)),
            pl.BlockSpec((tile_n, D_out_p), lambda i: (i, 0)),
            # Resident weights / biases (constant index_map -> single DMA).
            pl.BlockSpec((H_p, D_in_p), lambda i: (0, 0)),
            pl.BlockSpec((1, H_p), lambda i: (0, 0)),
            pl.BlockSpec((D_out_p, H_p), lambda i: (0, 0)),
            pl.BlockSpec((1, D_out_p), lambda i: (0, 0)),
        ],
        # Lane-dense per-lane partial sums; final cross-lane reduce in wrapper.
        out_specs=pl.BlockSpec((1, D_out_p), lambda i: (0, 0)),
        scratch_shapes=[pltpu.VMEM((1, D_out_p), jnp.float32)],
    )

    partial = pl.pallas_call(
        kernel,
        out_shape=jax.ShapeDtypeStruct((1, D_out_p), jnp.float32),
        grid_spec=grid_spec,
        compiler_params=pltpu.CompilerParams(
            # N axis feeds a shared accumulator -> "arbitrary".
            dimension_semantics=("arbitrary",),
            # Explicit scoped-VMEM budget; safe on v5e/v6e/v7x, ample headroom
            # for double-buffered x/y tiles + resident weights at these tiles.
            vmem_limit_bytes=32 * 1024 * 1024,
        ),
    )(x_p, y_p, w1_p, b1_p, w2_p, b2_p)

    return jnp.sum(partial)


def _reference_f32(x, y, w1, b1, w2, b2):
    h = jnp.tanh(x @ w1.T + b1)
    y_pred = h @ w2.T + b2
    return jnp.sum((y_pred - y) ** 2)


def _reference_bf16(x, y, w1, b1, w2, b2):
    # Mirrors the kernel's mixed precision (bf16 dot operands, f32 accumulate).
    xb, w1b, w2b = (a.astype(jnp.bfloat16) for a in (x, w1, w2))
    h = jnp.tanh(
        jax.lax.dot_general(xb, w1b, (((1,), (1,)), ((), ())),
                            preferred_element_type=jnp.float32) + b1
    )
    y_pred = (
        jax.lax.dot_general(h.astype(jnp.bfloat16), w2b, (((1,), (1,)), ((), ())),
                            preferred_element_type=jnp.float32) + b2
    )
    return jnp.sum((y_pred - y) ** 2)


if __name__ == "__main__":
    # Small shapes consistent with TwoLayerNet(D_in, H, D_out).
    N, D_in, H, D_out = 8, 32, 64, 16

    key = jax.random.PRNGKey(0)
    kx, ky, kw1, kb1, kw2, kb2 = jax.random.split(key, 6)

    x = jax.random.normal(kx, (N, D_in), dtype=jnp.float32)
    y = jax.random.normal(ky, (N, D_out), dtype=jnp.float32)

    # PyTorch-style Linear init: U(-1/sqrt(fan_in), 1/sqrt(fan_in)).
    s1 = 1.0 / (D_in ** 0.5)
    s2 = 1.0 / (H ** 0.5)
    w1 = jax.random.uniform(kw1, (H, D_in), jnp.float32, -s1, s1)
    b1 = jax.random.uniform(kb1, (H,), jnp.float32, -s1, s1)
    w2 = jax.random.uniform(kw2, (D_out, H), jnp.float32, -s2, s2)
    b2 = jax.random.uniform(kb2, (D_out,), jnp.float32, -s2, s2)

    loss = jax.block_until_ready(twolayer_net_loss(x, y, w1, b1, w2, b2))

    # Tight check against a precision-matched (bf16-operand) reference.
    ref_bf16 = _reference_bf16(x, y, w1, b1, w2, b2)
    assert jnp.allclose(loss, ref_bf16, rtol=1e-4, atol=1e-4), (loss, ref_bf16)

    # Loose check against the pure-f32 PyTorch-semantics reference
    # (bf16 matmul operands introduce ~1e-3 relative error).
    ref_f32 = _reference_f32(x, y, w1, b1, w2, b2)
    assert jnp.allclose(loss, ref_f32, rtol=5e-2, atol=5e-2), (loss, ref_f32)

    print("KERNEL_OK")
</pallas_src>

<mosaic_0001>
module attributes {stable_mosaic.version = 11 : i64} {
  func.func @kernel(%arg0: i32, %arg1: memref<8x128xbf16, #tpu.memory_space<vmem>>, %arg2: memref<8x128xf32, #tpu.memory_space<vmem>>, %arg3: memref<128x128xbf16, #tpu.memory_space<vmem>>, %arg4: memref<1x128xf32, #tpu.memory_space<vmem>>, %arg5: memref<128x128xbf16, #tpu.memory_space<vmem>>, %arg6: memref<1x128xf32, #tpu.memory_space<vmem>>, %arg7: memref<1x128xf32, #tpu.memory_space<vmem>>, %arg8: memref<1x128xf32, #tpu.memory_space<vmem>>) attributes {dimension_semantics = [#tpu.dimension_semantics<arbitrary>], iteration_bounds = array<i64: 1>, scalar_prefetch = 0 : i64, scratch_operands = 1 : i64, tpu.core_type = #tpu.core_type<tc>, window_params = [{transform_indices = @transform_0, window_bounds = array<i64: 8, 128>}, {transform_indices = @transform_1, window_bounds = array<i64: 8, 128>}, {pipeline_mode = #tpu.pipeline_mode<synchronous>, transform_indices = @transform_2, window_bounds = array<i64: 128, 128>}, {pipeline_mode = #tpu.pipeline_mode<synchronous>, transform_indices = @transform_3, window_bounds = array<i64: 1, 128>}, {pipeline_mode = #tpu.pipeline_mode<synchronous>, transform_indices = @transform_4, window_bounds = array<i64: 128, 128>}, {pipeline_mode = #tpu.pipeline_mode<synchronous>, transform_indices = @transform_5, window_bounds = array<i64: 1, 128>}, {pipeline_mode = #tpu.pipeline_mode<synchronous>, transform_indices = @transform_6, window_bounds = array<i64: 1, 128>}]} {
    %c0_i32 = arith.constant 0 : i32
    %0 = arith.cmpi eq, %arg0, %c0_i32 : i32
    %1 = arith.extui %0 : i1 to i32
    %c0_i32_0 = arith.constant 0 : i32
    %2 = arith.cmpi ne, %1, %c0_i32_0 : i32
    scf.if %2 {
      %cst_22 = arith.constant 0.000000e+00 : f32
      %35 = vector.broadcast %cst_22 : f32 to vector<1x128xf32>
      %c0_23 = arith.constant 0 : index
      %c0_24 = arith.constant 0 : index
      %36 = vector.load %arg8[%c0_23, %c0_24] : memref<1x128xf32, #tpu.memory_space<vmem>>, vector<1x128xf32>
      tpu.vector_store %arg8[%c0_23, %c0_24], %35 {strides = array<i32>} : memref<1x128xf32, #tpu.memory_space<vmem>>, vector<1x128xf32>,
    } else {
    }
    %c0 = arith.constant 0 : index
    %c0_1 = arith.constant 0 : index
    %3 = vector.load %arg1[%c0, %c0_1] : memref<8x128xbf16, #tpu.memory_space<vmem>>, vector<8x128xbf16>
    %c0_2 = arith.constant 0 : index
    %c0_3 = arith.constant 0 : index
    %4 = vector.load %arg3[%c0_2, %c0_3] : memref<128x128xbf16, #tpu.memory_space<vmem>>, vector<128x128xbf16>
    %cst = arith.constant dense<0.000000e+00> : vector<8x128xf32>
    %5 = tpu.matmul %3, %4, %cst {dimension_numbers = #tpu.dot_dimension_numbers<[1], [1], [0], [0], [0, 0, 1, 0], [], []>} : vector<8x128xbf16>, vector<128x128xbf16>, vector<8x128xf32> -> vector<8x128xf32>
    %c0_4 = arith.constant 0 : index
    %c0_5 = arith.constant 0 : index
    %6 = vector.load %arg4[%c0_4, %c0_5] : memref<1x128xf32, #tpu.memory_space<vmem>>, vector<1x128xf32>
    %7 = vector.broadcast %6 : vector<1x128xf32> to vector<8x128xf32>
    %8 = arith.addf %5, %7 : vector<8x128xf32>
    %9 = math.tanh %8 : vector<8x128xf32>
    %10 = arith.truncf %9 : vector<8x128xf32> to vector<8x128xbf16>
    %c0_6 = arith.constant 0 : index
    %c0_7 = arith.constant 0 : index
    %11 = vector.load %arg5[%c0_6, %c0_7] : memref<128x128xbf16, #tpu.memory_space<vmem>>, vector<128x128xbf16>
    %cst_8 = arith.constant dense<0.000000e+00> : vector<8x128xf32>
    %12 = tpu.matmul %10, %11, %cst_8 {dimension_numbers = #tpu.dot_dimension_numbers<[1], [1], [0], [0], [0, 0, 1, 0], [], []>} : vector<8x128xbf16>, vector<128x128xbf16>, vector<8x128xf32> -> vector<8x128xf32>
    %c0_9 = arith.constant 0 : index
    %c0_10 = arith.constant 0 : index
    %13 = vector.load %arg6[%c0_9, %c0_10] : memref<1x128xf32, #tpu.memory_space<vmem>>, vector<1x128xf32>
    %14 = vector.broadcast %13 : vector<1x128xf32> to vector<8x128xf32>
    %15 = arith.addf %12, %14 : vector<8x128xf32>
    %c0_11 = arith.constant 0 : index
    %c0_12 = arith.constant 0 : index
    %16 = vector.load %arg2[%c0_11, %c0_12] : memref<8x128xf32, #tpu.memory_space<vmem>>, vector<8x128xf32>
    %17 = arith.subf %15, %16 : vector<8x128xf32>
    %c8_i32 = arith.constant 8 : i32
    %18 = arith.muli %arg0, %c8_i32 : i32
    %19 = tpu.iota {dimensions = array<i32: 0>} : vector<8x128xi32>
    %20 = vector.broadcast %18 : i32 to vector<8x128xi32>
    %21 = arith.addi %20, %19 : vector<8x128xi32>
    %c8_i32_13 = arith.constant 8 : i32
    %22 = vector.broadcast %c8_i32_13 : i32 to vector<8x128xi32>
    %23 = arith.cmpi slt, %21, %22 : vector<8x128xi32>
    %24 = arith.mulf %17, %17 : vector<8x128xf32>
    %cst_14 = arith.constant 0.000000e+00 : f32
    %25 = vector.broadcast %cst_14 : f32 to vector<8x128xf32>
    %26 = arith.select %23, %24, %25 : vector<8x128xi1>, vector<8x128xf32>
    %c0_15 = arith.constant 0 : index
    %c0_16 = arith.constant 0 : index
    %27 = vector.load %arg8[%c0_15, %c0_16] : memref<1x128xf32, #tpu.memory_space<vmem>>, vector<1x128xf32>
    %cst_17 = arith.constant dense<0.000000e+00> : vector<128xf32>
    %28 = vector.multi_reduction <add>, %26, %cst_17 [0] : vector<8x128xf32> to vector<128xf32>
    %29 = vector.shape_cast %28 : vector<128xf32> to vector<1x128xf32>
    %30 = arith.addf %27, %29 : vector<1x128xf32>
    %c0_18 = arith.constant 0 : index
    %c0_19 = arith.constant 0 : index
    %31 = vector.load %arg8[%c0_18, %c0_19] : memref<1x128xf32, #tpu.memory_space<vmem>>, vector<1x128xf32>
    tpu.vector_store %arg8[%c0_18, %c0_19], %30 {strides = array<i32>} : memref<1x128xf32, #tpu.memory_space<vmem>>, vector<1x128xf32>,
    %c0_i32_20 = arith.constant 0 : i32
    %32 = arith.cmpi eq, %arg0, %c0_i32_20 : i32
    %33 = arith.extui %32 : i1 to i32
    %c0_i32_21 = arith.constant 0 : i32
    %34 = arith.cmpi ne, %33, %c0_i32_21 : i32
    scf.if %34 {
      %c0_22 = arith.constant 0 : index
      %c0_23 = arith.constant 0 : index
      %35 = vector.load %arg8[%c0_22, %c0_23] : memref<1x128xf32, #tpu.memory_space<vmem>>, vector<1x128xf32>
      %c0_24 = arith.constant 0 : index
      %c0_25 = arith.constant 0 : index
      %36 = vector.load %arg7[%c0_24, %c0_25] : memref<1x128xf32, #tpu.memory_space<vmem>>, vector<1x128xf32>
      tpu.vector_store %arg7[%c0_24, %c0_25], %35 {strides = array<i32>} : memref<1x128xf32, #tpu.memory_space<vmem>>, vector<1x128xf32>,
    } else {
    }
    return
  }
  func.func @transform_0(%arg0: i32) -> (i32, i32) {
    %c0_i32 = arith.constant 0 : i32
    %c0_i32_0 = arith.constant 0 : i32
    return %arg0, %c0_i32 : i32, i32
  }
  func.func @transform_1(%arg0: i32) -> (i32, i32) {
    %c0_i32 = arith.constant 0 : i32
    %c0_i32_0 = arith.constant 0 : i32
    return %arg0, %c0_i32 : i32, i32
  }
  func.func @transform_2(%arg0: i32) -> (i32, i32) {
    %c0_i32 = arith.constant 0 : i32
    %c0_i32_0 = arith.constant 0 : i32
    %c0_i32_1 = arith.constant 0 : i32
    return %c0_i32, %c0_i32_0 : i32, i32
  }
  func.func @transform_3(%arg0: i32) -> (i32, i32) {
    %c0_i32 = arith.constant 0 : i32
    %c0_i32_0 = arith.constant 0 : i32
    %c0_i32_1 = arith.constant 0 : i32
    return %c0_i32, %c0_i32_0 : i32, i32
  }
  func.func @transform_4(%arg0: i32) -> (i32, i32) {
    %c0_i32 = arith.constant 0 : i32
    %c0_i32_0 = arith.constant 0 : i32
    %c0_i32_1 = arith.constant 0 : i32
    return %c0_i32, %c0_i32_0 : i32, i32
  }
  func.func @transform_5(%arg0: i32) -> (i32, i32) {
    %c0_i32 = arith.constant 0 : i32
    %c0_i32_0 = arith.constant 0 : i32
    %c0_i32_1 = arith.constant 0 : i32
    return %c0_i32, %c0_i32_0 : i32, i32
  }
  func.func @transform_6(%arg0: i32) -> (i32, i32) {
    %c0_i32 = arith.constant 0 : i32
    %c0_i32_0 = arith.constant 0 : i32
    %c0_i32_1 = arith.constant 0 : i32
    return %c0_i32, %c0_i32_0 : i32, i32
  }
}

</mosaic_0001>

<bundles_post_ra>
// kernel: tpu_custom_call.1
= control target key start
LH: loop header
LB: loop body
LE: loop exit
PB: predicated region body
PF: predicated region fallthrough
CT: control target
= control target key end

     0   :  { %11 = vsyncpa [#allocation4], 0  ;;  %s623_s0 = inlined_call_operand.hbm [shape: bf16[8,128], index: 0, kind: input, shape index: {}]   ;;  %s624_s1 = inlined_call_operand.hbm [shape: f32[8,128], index: 1, kind: input, shape index: {}]   ;;  %s625_s2 = inlined_call_operand.hbm [shape: bf16[128,128], index: 2, kind: input, shape index: {}]   ;;  %s626_s3 = inlined_call_operand.vmem [shape: f32[1,128], index: 3, kind: input, shape index: {}]   ;;  %s627_s4 = inlined_call_operand.hbm [shape: bf16[128,128], index: 4, kind: input, shape index: {}]   ;;  %s628_s5 = inlined_call_operand.vmem [shape: f32[1,128], index: 5, kind: input, shape index: {}]   ;;  %s629_s6 = inlined_call_operand.hbm [shape: f32[1,128], index: 6, kind: output, shape index: {}]  }
   0x1   :  { %12 = vsyncpa [#allocation7], 0 }
   0x2   :  { %13 = vsyncpa [#allocation10], 0 }
   0x3   :  { %14 = vsyncpa [#allocation5], 0  ;;  %s558_s21 = smov [#allocation6]   ;;  %s559_s23 = smov [#allocation3]  }
   0x4   :  { %s31_s22 = sshll.u32 %s558_s21, 4  ;;  %s21_s24 = sshll.u32 %s559_s23, 4  ;;  %s32_s22 = int_to_ptr.vmem [resolvable:$true] %s31_s22  ;;  %s22_s24 = int_to_ptr.vmem [resolvable:$true] %s21_s24 }
   0x5   :  { %s458_s25 = scalar_lea.vmem %s32_s22, 128  ;;  %p463_p1 = scmp.lt.s32.totalorder %s32_s22, %s32_s22 }
   0x6   :  { %p459_p0 = scmp.ne.s32.totalorder %s32_s22, %s458_s25  ;;  %p464_p2 = scmp.lt.s32.totalorder %s458_s25, %s458_s25 }
   0x8   :  { %p465_p3 = por %p464_p2, %p463_p1 }
   0xa   :  { %p466_p4 = pnand %p465_p3, %p459_p0 }
   0xc   :  { %469 = shalt.err (!%p466_p4)
}
   0xd   :  { %34 = dma.hbm_to_vmem [thread:$0]  %s624_s1, 128, %s32_s22, [#allocation7]  }
   0xe   :  { %s478_s28 = scalar_lea.vmem %s22_s24, 64  ;;  %p483_p6 = scmp.lt.s32.totalorder %s22_s24, %s22_s24 }
   0xf   :  { %p479_p5 = scmp.ne.s32.totalorder %s22_s24, %s478_s28  ;;  %p484_p7 = scmp.lt.s32.totalorder %s478_s28, %s478_s28 }
  0x11   :  { %p485_p8 = por %p484_p7, %p483_p6 }
  0x13   :  { %p486_p9 = pnand %p485_p8, %p479_p5 }
  0x15   :  { %489 = shalt.err (!%p486_p9)
}
  0x16   :  { %24 = dma.hbm_to_vmem [thread:$0]  %s623_s0, 64, %s22_s24, [#allocation4]  }
  0x17   :  { %s560_s7 = smov [#allocation8]  }
  0x18   :  { %s40_s8 = sshll.u32 %s560_s7, 4  ;;  %s41_s8 = int_to_ptr.vmem [resolvable:$true] %s40_s8 }
  0x19   :  { %s498_s9 = scalar_lea.vmem %s41_s8, 1024  ;;  %p503_p11 = scmp.lt.s32.totalorder %s41_s8, %s41_s8 }
  0x1a   :  { %p499_p10 = scmp.ne.s32.totalorder %s41_s8, %s498_s9  ;;  %p504_p12 = scmp.lt.s32.totalorder %s498_s9, %s498_s9 }
  0x1c   :  { %p505_p13 = por %p504_p12, %p503_p11 }
  0x1e   :  { %p506_p0 = pnand %p505_p13, %p499_p10 }
  0x20   :  { %509 = shalt.err (!%p506_p0)
}
  0x21   :  { %s561_s1 = smov 64   ;;  %s562_s10 = smov 4  }
  0x22   :  { %46 = dma.hbm_to_vmem [thread:$0]  %s625_s2, 1024, %s41_s8, [#allocation7], %s561_s1, %s561_s1, %s562_s10  }
  0x23   :  { %s563_s13 = smov [#allocation9]  }
  0x24   :  { %s54_s14 = sshll.u32 %s563_s13, 4  ;;  %s55_s14 = int_to_ptr.vmem [resolvable:$true] %s54_s14 }
  0x25   :  { %s518_s0 = scalar_lea.vmem %s55_s14, 1024  ;;  %p523_p2 = scmp.lt.s32.totalorder %s55_s14, %s55_s14 }
  0x26   :  { %p519_p1 = scmp.ne.s32.totalorder %s55_s14, %s518_s0  ;;  %p524_p3 = scmp.lt.s32.totalorder %s518_s0, %s518_s0 }
  0x28   :  { %p525_p4 = por %p524_p3, %p523_p2 }
  0x2a   :  { %p526_p5 = pnand %p525_p4, %p519_p1 }
  0x2c   :  { %529 = shalt.err (!%p526_p5)
}
  0x2d   :  { %60 = dma.hbm_to_vmem [thread:$0]  %s627_s4, 1024, %s55_s14, [#allocation10], %s561_s1, %s561_s1, %s562_s10  }
  0x2e   :  { %550 = dma.done.wait [#allocation4], 64  }
  0x2f   :  { %551 = vsyncadd [#allocation4], 4294967232 }
  0x30   :  { %552 = dma.done.wait [#allocation7], 1152  }
  0x31   :  { %553 = vsyncadd [#allocation7], 4294966144 }
  0x32   :  { %554 = dma.done.wait [#allocation10], 1024  }
  0x33   :  { %555 = vsyncadd [#allocation10], 4294966272  ;;  %v564_v0 = vmov 0.0   ;;  %vm565_vm0 = vmmov 0   ;;  %v432_v1 = vld [vmem:[#allocation8 + $0x38] sm:$0xff]   ;;  %v433_v2 = vld [vmem:[#allocation8 + $0x30] sm:$0xff]  }
  0x34   :  { %383 = vmatprep.subr.bf16.mxu0 %v564_v0  ;;  %80 = vst [vmem:[#allocation2] sm:$0x1] %v564_v0  ;;  %399 = vmatprep.mubr.msk.bf16.mxu0 %vm565_vm0, %v564_v0  ;;  %v440_v3 = vld [vmem:[#allocation9 + $0x38] sm:$0xff]   ;;  %v434_v4 = vld [vmem:[#allocation8 + $0x28] sm:$0xff]   ;;  %v441_v5 = vld [vmem:[#allocation9 + $0x30] sm:$0xff]  }
  0x35   :  { %403 = vmatprep.subr.bf16.mxu1 %v564_v0  ;;  %419 = vmatprep.mubr.msk.bf16.mxu1 %vm565_vm0, %v564_v0  ;;  %v435_v6 = vld [vmem:[#allocation8 + $0x20] sm:$0xff]   ;;  %v442_v7 = vld [vmem:[#allocation9 + $0x28] sm:$0xff]   ;;  %v436_v8 = vld [vmem:[#allocation8 + $0x18] sm:$0xff]  }
  0x36   :  { %384 = vmatpush3.bf16.xpose.msra.mxu0 %v432_v1  ;;  %404 = vmatpush3.bf16.xpose.msra.mxu1 %v440_v3  ;;  %v443_v9 = vld [vmem:[#allocation9 + $0x20] sm:$0xff]   ;;  %v437_v10 = vld [vmem:[#allocation8 + $0x10] sm:$0xff]   ;;  %v444_v11 = vld [vmem:[#allocation9 + $0x18] sm:$0xff]  }
  0x37   :  { %385 = vmatprep.subr.bf16.mxu0 %v564_v0  ;;  %405 = vmatprep.subr.bf16.mxu1 %v564_v0  ;;  %v438_v12 = vld [vmem:[#allocation8 + $0x8] sm:$0xff]   ;;  %v445_v13 = vld [vmem:[#allocation9 + $0x10] sm:$0xff]   ;;  %v439_v14 = vld [vmem:[#allocation8] sm:$0xff]  }
  0x38   :  { %v81_v15 = vld [vmem:[#allocation3] sm:$0xf]  ;;  %v446_v16 = vld [vmem:[#allocation9 + $0x8] sm:$0xff]   ;;  %v447_v17 = vld [vmem:[#allocation9] sm:$0xff]  }
  0x39   :  { %v347_v18 = vld [vmem:[%s626_s3] ss:$0 sm:$0xff]  ;;  %v306_v28 = vld [vmem:[#allocation6] sm:$0xff]  ;;  %s566_s3 = smov [#allocation11]  }
  0x3a   :  { %v356_v26 = vld [vmem:[%s628_s5] ss:$0 sm:$0xff]  ;;  %s336_s19 = sshll.u32 %s566_s3, 4  ;;  %s337_s19 = int_to_ptr.vmem [resolvable:$true] %s336_s19 }
  0x3b   :  { %v316_v40 = vld [vmem:[#allocation2] sm:$0x1]  ;;  %s530_s5 = scalar_lea.vmem %s337_s19, 16  ;;  %s534_s20 = scalar_lea.vmem %s337_s19, 32 }
  0x3c   :  { %p531_p6 = scmp.ne.s32.totalorder %s337_s19, %s530_s5  ;;  %p535_p7 = scmp.lt.s32.totalorder %s337_s19, %s337_s19 }
  0x3d   :  { %p536_p8 = scmp.lt.s32.totalorder %s534_s20, %s530_s5 }
  0x3e   :  { %386 = vmatpush3.bf16.xpose.msra.mxu0 %v433_v2  ;;  %406 = vmatpush3.bf16.xpose.msra.mxu1 %v441_v5 }
  0x3f   :  { %387 = vmatprep.subr.bf16.mxu0 %v564_v0  ;;  %407 = vmatprep.subr.bf16.mxu1 %v564_v0  ;;  %p537_p9 = por %p536_p8, %p535_p7 }
  0x41   :  { %p538_p10 = pnand %p537_p9, %p531_p6 }
  0x46   :  { %388 = vmatpush3.bf16.xpose.msra.mxu0 %v434_v4  ;;  %408 = vmatpush3.bf16.xpose.msra.mxu1 %v442_v7 }
  0x47   :  { %389 = vmatprep.subr.bf16.mxu0 %v564_v0  ;;  %409 = vmatprep.subr.bf16.mxu1 %v564_v0 }
  0x4e   :  { %390 = vmatpush3.bf16.xpose.msra.mxu0 %v435_v6  ;;  %410 = vmatpush3.bf16.xpose.msra.mxu1 %v443_v9 }
  0x4f   :  { %391 = vmatprep.subr.bf16.mxu0 %v564_v0  ;;  %411 = vmatprep.subr.bf16.mxu1 %v564_v0 }
  0x56   :  { %392 = vmatpush3.bf16.xpose.msra.mxu0 %v436_v8  ;;  %412 = vmatpush3.bf16.xpose.msra.mxu1 %v444_v11 }
  0x57   :  { %393 = vmatprep.subr.bf16.mxu0 %v564_v0  ;;  %413 = vmatprep.subr.bf16.mxu1 %v564_v0 }
  0x5e   :  { %394 = vmatpush3.bf16.xpose.msra.mxu0 %v437_v10  ;;  %414 = vmatpush3.bf16.xpose.msra.mxu1 %v445_v13 }
  0x5f   :  { %395 = vmatprep.subr.bf16.mxu0 %v564_v0  ;;  %415 = vmatprep.subr.bf16.mxu1 %v564_v0 }
  0x66   :  { %396 = vmatpush3.bf16.xpose.msra.mxu0 %v438_v12  ;;  %416 = vmatpush3.bf16.xpose.msra.mxu1 %v446_v16 }
  0x67   :  { %397 = vmatprep.subr.bf16.mxu0 %v564_v0  ;;  %417 = vmatprep.subr.bf16.mxu1 %v564_v0 }
  0x6e   :  { %398 = vmatpush3.bf16.xpose.msra.mxu0 %v439_v14  ;;  %418 = vmatpush3.bf16.xpose.msra.mxu1 %v447_v17 }
  0x75   :  { %400 = vmatmul.mubr.bf16.vlgmr.msra.gmra.mxu0 %v81_v15 }
 0x135   :  { %v187_v19 = vpop.f32.mrf.mxu0 }
 0x136   :  { %v188_v20 = vadd.f32 %v347_v18, %v187_v19 }
 0x137   :  { %v401_v21 = vpop.f32.mrf.mxu0 }
 0x138   :  { %448 = vtanh.f32 %v188_v20 }
 0x139   :  { %v190_v22 = vpop.f32.mrf.mxu0 }
 0x13b   :  { %v402_v23 = vpop.f32.mrf.mxu0 }
 0x145   :  { %v449_v24 = vpop.eup %448 }
 0x146   :  { %v194_v25 = vpack.c.bf16 %v449_v24, %v449_v24 }
 0x148   :  { %420 = vmatmul.mubr.bf16.vlgmr.msra.gmra.mxu1 %v194_v25 }
 0x208   :  { %v300_v27 = vpop.f32.mrf.mxu1 }
 0x209   :  { %v301_v29 = vadd.f32 %v356_v26, %v300_v27 }
 0x20a   :  { %v421_v30 = vpop.f32.mrf.mxu1 }
 0x20b   :  { %v307_v31 = vsub.f32 %v301_v29, %v306_v28 }
 0x20c   :  { %v303_v32 = vpop.f32.mrf.mxu1 }
 0x20d   :  { %v314_v33 = vmul.f32 %v307_v31, %v307_v31 }
 0x20e   :  { %v422_v34 = vpop.f32.mrf.mxu1 }
 0x20f   :  { %v317_v35 = vrot.slane %v314_v33, 4 }
 0x211   :  { %v318_v36 = vadd.f32 %v317_v35, %v314_v33 }
 0x213   :  { %v319_v37 = vrot.slane %v318_v36, 2 }
 0x215   :  { %v320_v38 = vadd.f32 %v319_v37, %v318_v36 }
 0x217   :  { %v321_v39 = vrot.slane %v320_v38, 1 }
 0x219   :  { %v322_v41 = vadd.f32 %v321_v39, %v320_v38 }
 0x21b   :  { %v323_v42 = vadd.f32 %v322_v41, %v316_v40 }
 0x21d   :  { %324 = vst [vmem:[#allocation2] sm:$0x1] %v323_v42 }
 0x224   :  { %v328_v43 = vld [vmem:[#allocation2] sm:$0x1] }
 0x225   :  { %329 = vst [vmem:[#allocation11] sm:$0x1] %v328_v43 }
 0x226   :  { %541 = shalt.err (!%p538_p10)
}
 0x227   :  { %339 = dma.vmem_to_hbm [thread:$0]  %s337_s19, 16, %s629_s6, [#allocation5]  }
 0x228   :  { %556 = dma.done.wait [#allocation5], 16  }
 0x229   :  { %557 = vsyncadd [#allocation5], 4294967280 }
 0x22a   :  { %343 = vsyncpa [#allocation4], 1 }
 0x22b   :  { %344 = vsyncpa [#allocation7], 1 }
 0x22c   :  { %345 = vsyncpa [#allocation10], 1 }
 0x22d   :  { %346 = vsyncpa [#allocation5], 1 }

</bundles_post_ra>
